<compile_context>
chip_gen: v7x
topology: tpu7x:2x2x1
jax: 0.10.0
libtpu: 0.0.40
codegen_flags: <defaults>
</compile_context>

<pallas_src>
import jax
import jax.numpy as jnp
from jax.experimental import pallas as pl
from jax.experimental.pallas import tpu as pltpu

N_QUBITS = 4
TB_MAX = 2048   # max batch elements per tile (lane axis)
LANE = 128      # lane granularity — batch sits on the lane axis


def _cdiv(a, b):
    return -(-a // b)


def _round_up(x, m):
    return _cdiv(x, m) * m


def decoder_kernel(q_ref, w1t_ref, b1_ref, w2t_ref, b2_ref, w3t_ref, b3_ref,
                   w4_ref, b4_ref, out_ref):
    # Feature-major: features on sublanes, batch on the 128-wide lane axis, so
    # every activation is lane-dense and the output store is unmasked.
    q = q_ref[...]                                                   # (4, TB)

    # MLP head: Linear(4,64)+ReLU -> Linear(64,32)+ReLU -> Linear(32,4)+ReLU
    # (Dropout = identity at inference), matmuls in transposed orientation.
    h = jnp.dot(w1t_ref[...], q, preferred_element_type=jnp.float32) + b1_ref[...]
    h = jnp.maximum(h, 0.0)                                          # (64, TB)
    h = jnp.dot(w2t_ref[...], h, preferred_element_type=jnp.float32) + b2_ref[...]
    h = jnp.maximum(h, 0.0)                                          # (32, TB)
    h = jnp.dot(w3t_ref[...], h, preferred_element_type=jnp.float32) + b3_ref[...]
    h = jnp.maximum(h, 0.0)                                          # (4, TB)

    # final Linear(4,1): 4 explicit row FMAs on full-lane vregs
    w4 = w4_ref[...]                                                 # (4, 1)
    z = (h[0:1, :] * w4[0:1, :] + h[1:2, :] * w4[1:2, :]
         + h[2:3, :] * w4[2:3, :] + h[3:4, :] * w4[3:4, :]) + b4_ref[...]
    # sigmoid via tanh (EUP slot, numerically stable)
    out_ref[...] = 0.5 * (jnp.tanh(0.5 * z) + 1.0)                   # (1, TB)


@jax.jit
def decoder_forward(features, params):
    f32 = jnp.float32
    x = features.astype(f32)
    B = x.shape[0]
    assert x.shape[1] == N_QUBITS

    # --- tile selection: even #blocks (>=2, balanced across v7x's two TCs),
    #     near-equal lane-dense tiles, minimal padding ---
    n_blocks = max(2, _cdiv(B, TB_MAX))
    if n_blocks % 2:
        n_blocks += 1
    TB = _round_up(_cdiv(B, n_blocks), LANE)
    B_pad = n_blocks * TB
    if B_pad != B:
        x = jnp.pad(x, ((0, B_pad - B), (0, 0)))

    # --- analytic 4-qubit circuit (elementwise, ~12 flops/row): fuses with the
    #     transpose into one XLA pass producing the lane-dense (4, B_pad) slab ---
    a, b, c = params["qa"], params["qb"], params["qc"]               # (1,4) each
    sx, cx = jnp.sin(x), jnp.cos(x)
    K1 = jnp.cos(b)
    K2 = jnp.sin(a) * jnp.sin(b)
    K3 = jnp.sin(a) * jnp.cos(b) * jnp.sin(c) - jnp.cos(a) * jnp.cos(c)
    K4 = jnp.sin(b) * jnp.sin(c)
    zk = cx * K1 - sx * K2                                           # <Z_k> pre-ring
    yk = sx * K3 + cx * K4                                           # <Y_k> pre-ring
    q = jnp.roll(zk, 1, axis=1) * yk * jnp.roll(zk, -1, axis=1)      # <Z_{i-1} Y_i Z_{i+1}>
    qT = q.T                                                         # (4, B_pad), batch on lanes

    # pre-transposed weights so activations stay lane-dense inside the kernel
    w1t = params["w1"].T          # (64, 4)
    w2t = params["w2"].T          # (32, 64)
    w3t = params["w3"].T          # (4, 32)
    b1c = params["b1"].T          # (64, 1)
    b2c = params["b2"].T          # (32, 1)
    b3c = params["b3"].T          # (4, 1)
    w4c = params["w4"]            # (4, 1)
    b4c = params["b4"]            # (1, 1)

    const = lambda r, c_: pl.BlockSpec((r, c_), lambda i: (0, 0))
    out = pl.pallas_call(
        decoder_kernel,
        out_shape=jax.ShapeDtypeStruct((1, B_pad), f32),
        grid=(n_blocks,),
        in_specs=[
            pl.BlockSpec((N_QUBITS, TB), lambda i: (0, i)),          # qT stream
            const(64, 4), const(64, 1),                              # w1T, b1
            const(32, 64), const(32, 1),                             # w2T, b2
            const(4, 32), const(4, 1),                               # w3T, b3
            const(4, 1), const(1, 1),                                # w4, b4
        ],
        out_specs=pl.BlockSpec((1, TB), lambda i: (0, i)),
        compiler_params=pltpu.CompilerParams(
            dimension_semantics=("parallel",),
        ),
    )(qT, w1t, b1c, w2t, b2c, w3t, b3c, w4c, b4c)

    # lane-dense (1, B_pad) -> (B, 1); reshape BEFORE slicing off padding
    return out.reshape(B_pad, 1)[:B]


def decoder_ref(features, params):
    """Pure-JAX reference of the same math (sanity check)."""
    x = features.astype(jnp.float32)
    a, b, c = params["qa"], params["qb"], params["qc"]
    zk = jnp.cos(x) * jnp.cos(b) - jnp.sin(x) * jnp.sin(a) * jnp.sin(b)
    yk = (jnp.sin(a) * jnp.sin(x) * jnp.cos(b) + jnp.cos(x) * jnp.sin(b)) * jnp.sin(c) \
        - jnp.cos(a) * jnp.sin(x) * jnp.cos(c)
    q = jnp.roll(zk, 1, axis=1) * yk * jnp.roll(zk, -1, axis=1)
    h = jax.nn.relu(q @ params["w1"] + params["b1"])
    h = jax.nn.relu(h @ params["w2"] + params["b2"])
    h = jax.nn.relu(h @ params["w3"] + params["b3"])
    return jax.nn.sigmoid(h @ params["w4"] + params["b4"])


def init_params(key):
    f32 = jnp.float32
    ks = jax.random.split(key, 9)
    qw = jax.random.uniform(ks[0], (1, 3 * N_QUBITS), minval=0.0, maxval=2.0 * jnp.pi, dtype=f32)
    return {
        "qa": qw[:, 0::3], "qb": qw[:, 1::3], "qc": qw[:, 2::3],
        "w1": 0.3 * jax.random.normal(ks[1], (4, 64), dtype=f32),
        "b1": 0.1 * jax.random.normal(ks[2], (1, 64), dtype=f32),
        "w2": 0.2 * jax.random.normal(ks[3], (64, 32), dtype=f32),
        "b2": 0.1 * jax.random.normal(ks[4], (1, 32), dtype=f32),
        "w3": 0.3 * jax.random.normal(ks[5], (32, 4), dtype=f32),
        "b3": 0.1 * jax.random.normal(ks[6], (1, 4), dtype=f32),
        "w4": 0.5 * jax.random.normal(ks[7], (4, 1), dtype=f32),
        "b4": 0.1 * jax.random.normal(ks[8], (1, 1), dtype=f32),
    }


if __name__ == "__main__":
    root = jax.random.PRNGKey(0)
    k_params, k_x = jax.random.split(root)
    params = init_params(k_params)

    # small-shape check (2 tiles of TB=128, mostly padding but trivially fast)
    B = 8
    features = jax.random.uniform(k_x, (B, N_QUBITS), minval=-jnp.pi, maxval=jnp.pi,
                                  dtype=jnp.float32)
    out = jax.block_until_ready(decoder_forward(features, params))
    ref = decoder_ref(features, params)
    assert out.shape == (B, 1) and out.dtype == jnp.float32
    assert bool(jnp.all(jnp.isfinite(out)))
    assert bool(jnp.allclose(out, ref, atol=1e-3)), (out, ref)

    # larger, non-multiple batch: 2 balanced lane-dense tiles (TB=1280, ~2% padding),
    # exercises the multi-block "parallel" grid path (shardable across v7x's 2 TCs).
    B2 = 2500
    feats2 = jax.random.uniform(jax.random.PRNGKey(1), (B2, N_QUBITS),
                                minval=-jnp.pi, maxval=jnp.pi, dtype=jnp.float32)
    out2 = jax.block_until_ready(decoder_forward(feats2, params))
    ref2 = decoder_ref(feats2, params)
    assert out2.shape == (B2, 1)
    assert bool(jnp.all(jnp.isfinite(out2)))
    assert bool(jnp.allclose(out2, ref2, atol=1e-3))

    print("KERNEL_OK")
</pallas_src>

<mosaic_0001>
module attributes {stable_mosaic.version = 11 : i64} {
  func.func @decoder_kernel(%arg0: i32, %arg1: memref<4x128xf32, #tpu.memory_space<vmem>>, %arg2: memref<64x4xf32, #tpu.memory_space<vmem>>, %arg3: memref<64x1xf32, #tpu.memory_space<vmem>>, %arg4: memref<32x64xf32, #tpu.memory_space<vmem>>, %arg5: memref<32x1xf32, #tpu.memory_space<vmem>>, %arg6: memref<4x32xf32, #tpu.memory_space<vmem>>, %arg7: memref<4x1xf32, #tpu.memory_space<vmem>>, %arg8: memref<4x1xf32, #tpu.memory_space<vmem>>, %arg9: memref<1x1xf32, #tpu.memory_space<vmem>>, %arg10: memref<1x128xf32, #tpu.memory_space<vmem>>) attributes {dimension_semantics = [#tpu.dimension_semantics<parallel>], iteration_bounds = array<i64: 2>, scalar_prefetch = 0 : i64, scratch_operands = 0 : i64, tpu.core_type = #tpu.core_type<tc>, window_params = [{transform_indices = @transform_0, window_bounds = array<i64: 4, 128>}, {pipeline_mode = #tpu.pipeline_mode<synchronous>, transform_indices = @transform_1, window_bounds = array<i64: 64, 4>}, {pipeline_mode = #tpu.pipeline_mode<synchronous>, transform_indices = @transform_2, window_bounds = array<i64: 64, 1>}, {pipeline_mode = #tpu.pipeline_mode<synchronous>, transform_indices = @transform_3, window_bounds = array<i64: 32, 64>}, {pipeline_mode = #tpu.pipeline_mode<synchronous>, transform_indices = @transform_4, window_bounds = array<i64: 32, 1>}, {pipeline_mode = #tpu.pipeline_mode<synchronous>, transform_indices = @transform_5, window_bounds = array<i64: 4, 32>}, {pipeline_mode = #tpu.pipeline_mode<synchronous>, transform_indices = @transform_6, window_bounds = array<i64: 4, 1>}, {pipeline_mode = #tpu.pipeline_mode<synchronous>, transform_indices = @transform_7, window_bounds = array<i64: 4, 1>}, {pipeline_mode = #tpu.pipeline_mode<synchronous>, transform_indices = @transform_8, window_bounds = array<i64: 1, 1>}, {transform_indices = @transform_9, window_bounds = array<i64: 1, 128>}]} {
    %c0 = arith.constant 0 : index
    %c0_0 = arith.constant 0 : index
    %0 = vector.load %arg1[%c0, %c0_0] : memref<4x128xf32, #tpu.memory_space<vmem>>, vector<4x128xf32>
    %c0_1 = arith.constant 0 : index
    %c0_2 = arith.constant 0 : index
    %1 = vector.load %arg2[%c0_1, %c0_2] : memref<64x4xf32, #tpu.memory_space<vmem>>, vector<64x4xf32>
    %cst = arith.constant dense<0.000000e+00> : vector<64x128xf32>
    %2 = tpu.matmul %1, %0, %cst {dimension_numbers = #tpu.dot_dimension_numbers<[1], [0], [0], [1], [0, 0, 1, 1], [], []>} : vector<64x4xf32>, vector<4x128xf32>, vector<64x128xf32> -> vector<64x128xf32>
    %c0_3 = arith.constant 0 : index
    %c0_4 = arith.constant 0 : index
    %3 = vector.load %arg3[%c0_3, %c0_4] : memref<64x1xf32, #tpu.memory_space<vmem>>, vector<64x1xf32>
    %4 = vector.broadcast %3 : vector<64x1xf32> to vector<64x128xf32>
    %5 = arith.addf %2, %4 : vector<64x128xf32>
    %cst_5 = arith.constant 0.000000e+00 : f32
    %6 = vector.broadcast %cst_5 : f32 to vector<64x128xf32>
    %7 = arith.maximumf %5, %6 : vector<64x128xf32>
    %c0_6 = arith.constant 0 : index
    %c0_7 = arith.constant 0 : index
    %8 = vector.load %arg4[%c0_6, %c0_7] : memref<32x64xf32, #tpu.memory_space<vmem>>, vector<32x64xf32>
    %cst_8 = arith.constant dense<0.000000e+00> : vector<32x128xf32>
    %9 = tpu.matmul %8, %7, %cst_8 {dimension_numbers = #tpu.dot_dimension_numbers<[1], [0], [0], [1], [0, 0, 1, 1], [], []>} : vector<32x64xf32>, vector<64x128xf32>, vector<32x128xf32> -> vector<32x128xf32>
    %c0_9 = arith.constant 0 : index
    %c0_10 = arith.constant 0 : index
    %10 = vector.load %arg5[%c0_9, %c0_10] : memref<32x1xf32, #tpu.memory_space<vmem>>, vector<32x1xf32>
    %11 = vector.broadcast %10 : vector<32x1xf32> to vector<32x128xf32>
    %12 = arith.addf %9, %11 : vector<32x128xf32>
    %cst_11 = arith.constant 0.000000e+00 : f32
    %13 = vector.broadcast %cst_11 : f32 to vector<32x128xf32>
    %14 = arith.maximumf %12, %13 : vector<32x128xf32>
    %c0_12 = arith.constant 0 : index
    %c0_13 = arith.constant 0 : index
    %15 = vector.load %arg6[%c0_12, %c0_13] : memref<4x32xf32, #tpu.memory_space<vmem>>, vector<4x32xf32>
    %cst_14 = arith.constant dense<0.000000e+00> : vector<4x128xf32>
    %16 = tpu.matmul %15, %14, %cst_14 {dimension_numbers = #tpu.dot_dimension_numbers<[1], [0], [0], [1], [0, 0, 1, 1], [], []>} : vector<4x32xf32>, vector<32x128xf32>, vector<4x128xf32> -> vector<4x128xf32>
    %c0_15 = arith.constant 0 : index
    %c0_16 = arith.constant 0 : index
    %17 = vector.load %arg7[%c0_15, %c0_16] : memref<4x1xf32, #tpu.memory_space<vmem>>, vector<4x1xf32>
    %18 = vector.broadcast %17 : vector<4x1xf32> to vector<4x128xf32>
    %19 = arith.addf %16, %18 : vector<4x128xf32>
    %cst_17 = arith.constant 0.000000e+00 : f32
    %20 = vector.broadcast %cst_17 : f32 to vector<4x128xf32>
    %21 = arith.maximumf %19, %20 : vector<4x128xf32>
    %c0_18 = arith.constant 0 : index
    %c0_19 = arith.constant 0 : index
    %22 = vector.load %arg8[%c0_18, %c0_19] : memref<4x1xf32, #tpu.memory_space<vmem>>, vector<4x1xf32>
    %23 = vector.extract_strided_slice %21 {offsets = [0, 0], sizes = [1, 128], strides = [1, 1]} : vector<4x128xf32> to vector<1x128xf32>
    %24 = vector.extract_strided_slice %22 {offsets = [0, 0], sizes = [1, 1], strides = [1, 1]} : vector<4x1xf32> to vector<1x1xf32>
    %25 = vector.broadcast %24 : vector<1x1xf32> to vector<1x128xf32>
    %26 = arith.mulf %23, %25 : vector<1x128xf32>
    %27 = vector.extract_strided_slice %21 {offsets = [1, 0], sizes = [1, 128], strides = [1, 1]} : vector<4x128xf32> to vector<1x128xf32>
    %28 = vector.extract_strided_slice %22 {offsets = [1, 0], sizes = [1, 1], strides = [1, 1]} : vector<4x1xf32> to vector<1x1xf32>
    %29 = vector.broadcast %28 : vector<1x1xf32> to vector<1x128xf32>
    %30 = arith.mulf %27, %29 : vector<1x128xf32>
    %31 = arith.addf %26, %30 : vector<1x128xf32>
    %32 = vector.extract_strided_slice %21 {offsets = [2, 0], sizes = [1, 128], strides = [1, 1]} : vector<4x128xf32> to vector<1x128xf32>
    %33 = vector.extract_strided_slice %22 {offsets = [2, 0], sizes = [1, 1], strides = [1, 1]} : vector<4x1xf32> to vector<1x1xf32>
    %34 = vector.broadcast %33 : vector<1x1xf32> to vector<1x128xf32>
    %35 = arith.mulf %32, %34 : vector<1x128xf32>
    %36 = arith.addf %31, %35 : vector<1x128xf32>
    %37 = vector.extract_strided_slice %21 {offsets = [3, 0], sizes = [1, 128], strides = [1, 1]} : vector<4x128xf32> to vector<1x128xf32>
    %38 = vector.extract_strided_slice %22 {offsets = [3, 0], sizes = [1, 1], strides = [1, 1]} : vector<4x1xf32> to vector<1x1xf32>
    %39 = vector.broadcast %38 : vector<1x1xf32> to vector<1x128xf32>
    %40 = arith.mulf %37, %39 : vector<1x128xf32>
    %41 = arith.addf %36, %40 : vector<1x128xf32>
    %c0_20 = arith.constant 0 : index
    %c0_21 = arith.constant 0 : index
    %42 = vector.load %arg9[%c0_20, %c0_21] : memref<1x1xf32, #tpu.memory_space<vmem>>, vector<1x1xf32>
    %43 = vector.broadcast %42 : vector<1x1xf32> to vector<1x128xf32>
    %44 = arith.addf %41, %43 : vector<1x128xf32>
    %cst_22 = arith.constant 5.000000e-01 : f32
    %45 = vector.broadcast %cst_22 : f32 to vector<1x128xf32>
    %46 = arith.mulf %45, %44 : vector<1x128xf32>
    %47 = math.tanh %46 : vector<1x128xf32>
    %cst_23 = arith.constant 1.000000e+00 : f32
    %48 = vector.broadcast %cst_23 : f32 to vector<1x128xf32>
    %49 = arith.addf %47, %48 : vector<1x128xf32>
    %cst_24 = arith.constant 5.000000e-01 : f32
    %50 = vector.broadcast %cst_24 : f32 to vector<1x128xf32>
    %51 = arith.mulf %50, %49 : vector<1x128xf32>
    %c0_25 = arith.constant 0 : index
    %c0_26 = arith.constant 0 : index
    %52 = vector.load %arg10[%c0_25, %c0_26] : memref<1x128xf32, #tpu.memory_space<vmem>>, vector<1x128xf32>
    tpu.vector_store %arg10[%c0_25, %c0_26], %51 {strides = array<i32>} : memref<1x128xf32, #tpu.memory_space<vmem>>, vector<1x128xf32>,
    return
  }
  func.func @transform_0(%arg0: i32) -> (i32, i32) {
    %c0_i32 = arith.constant 0 : i32
    %c0_i32_0 = arith.constant 0 : i32
    return %c0_i32, %arg0 : i32, i32
  }
  func.func @transform_1(%arg0: i32) -> (i32, i32) {
    %c0_i32 = arith.constant 0 : i32
    %c0_i32_0 = arith.constant 0 : i32
    %c0_i32_1 = arith.constant 0 : i32
    return %c0_i32, %c0_i32_0 : i32, i32
  }
  func.func @transform_2(%arg0: i32) -> (i32, i32) {
    %c0_i32 = arith.constant 0 : i32
    %c0_i32_0 = arith.constant 0 : i32
    %c0_i32_1 = arith.constant 0 : i32
    return %c0_i32, %c0_i32_0 : i32, i32
  }
  func.func @transform_3(%arg0: i32) -> (i32, i32) {
    %c0_i32 = arith.constant 0 : i32
    %c0_i32_0 = arith.constant 0 : i32
    %c0_i32_1 = arith.constant 0 : i32
    return %c0_i32, %c0_i32_0 : i32, i32
  }
  func.func @transform_4(%arg0: i32) -> (i32, i32) {
    %c0_i32 = arith.constant 0 : i32
    %c0_i32_0 = arith.constant 0 : i32
    %c0_i32_1 = arith.constant 0 : i32
    return %c0_i32, %c0_i32_0 : i32, i32
  }
  func.func @transform_5(%arg0: i32) -> (i32, i32) {
    %c0_i32 = arith.constant 0 : i32
    %c0_i32_0 = arith.constant 0 : i32
    %c0_i32_1 = arith.constant 0 : i32
    return %c0_i32, %c0_i32_0 : i32, i32
  }
  func.func @transform_6(%arg0: i32) -> (i32, i32) {
    %c0_i32 = arith.constant 0 : i32
    %c0_i32_0 = arith.constant 0 : i32
    %c0_i32_1 = arith.constant 0 : i32
    return %c0_i32, %c0_i32_0 : i32, i32
  }
  func.func @transform_7(%arg0: i32) -> (i32, i32) {
    %c0_i32 = arith.constant 0 : i32
    %c0_i32_0 = arith.constant 0 : i32
    %c0_i32_1 = arith.constant 0 : i32
    return %c0_i32, %c0_i32_0 : i32, i32
  }
  func.func @transform_8(%arg0: i32) -> (i32, i32) {
    %c0_i32 = arith.constant 0 : i32
    %c0_i32_0 = arith.constant 0 : i32
    %c0_i32_1 = arith.constant 0 : i32
    return %c0_i32, %c0_i32_0 : i32, i32
  }
  func.func @transform_9(%arg0: i32) -> (i32, i32) {
    %c0_i32 = arith.constant 0 : i32
    %c0_i32_0 = arith.constant 0 : i32
    return %c0_i32, %arg0 : i32, i32
  }
}

</mosaic_0001>

<bundles_post_ra>
// kernel: decoder_forward.1
= control target key start
LH: loop header
LB: loop body
LE: loop exit
PB: predicated region body
PF: predicated region fallthrough
CT: control target
= control target key end

     0   :  { %s1017_s11 = smov 0   ;;  %s1131_s0 = inlined_call_operand.vmem [shape: f32[4,256], index: 0, kind: input, shape index: {}]   ;;  %s1132_s1 = inlined_call_operand.vmem [shape: f32[64,4], index: 1, kind: input, shape index: {}]   ;;  %s1133_s2 = inlined_call_operand.vmem [shape: f32[64,1], index: 2, kind: input, shape index: {}]   ;;  %s1134_s3 = inlined_call_operand.vmem [shape: f32[32,64], index: 3, kind: input, shape index: {}]   ;;  %s1135_s4 = inlined_call_operand.vmem [shape: f32[32,1], index: 4, kind: input, shape index: {}]   ;;  %s1136_s5 = inlined_call_operand.vmem [shape: f32[4,32], index: 5, kind: input, shape index: {}]   ;;  %s1137_s6 = inlined_call_operand.vmem [shape: f32[4,1], index: 6, kind: input, shape index: {}]   ;;  %s1138_s7 = inlined_call_operand.vmem [shape: f32[4,1], index: 7, kind: input, shape index: {}]   ;;  %s1139_s8 = inlined_call_operand.<no memory space> [shape: f32[1,1], index: 8, kind: input, shape index: {}]   ;;  %s1140_s9 = inlined_call_operand.vmem [shape: f32[1,256], index: 9, kind: output, shape index: {}]  }
   0x1   :  { %v14_v0 = vstv %s1139_s8 }
   0x2   :  { %15 = vst [vmem:[#allocation2] sm:$0x1] %v14_v0 }
   0x3 LB: > { %s819_s12 = sadd.s32 4294967295, %s958_s11   ;;  %p823_p0 = scmp.ge.s32.totalorder %s958_s11, 1  ;;  %s958_s11 = sphi %s1017_s11, %s21_s11  }
   0x4   : > { %p288_p1 = scmp.lt.s32.totalorder %s958_s11, 3 }
   0x6   : > { %p289_p2 = pnand %p823_p0, %p288_p1 }
   0x7   : > { %p321_p3 = scmp.lt.s32.totalorder (!%p289_p2), %s819_s12, 1  ;;  %v329_v1 = vld [vmem:[%s1132_s1] sm:$0xff] (!%p289_p2)  ;;  %vm385_vm0 = vcmask (!%p289_p2), 31744   ;;  %v960_v2 = vmov (!%p289_p2), 0   ;;  %v339_v4 = vld [vmem:[%s1133_s2 + $0x10] sm:$0xff] (!%p289_p2)  ;;  %vm410_vm1 = vcmask (!%p289_p2), 1043456  }
   0x8   : > { %292 = sbr.rel (%p289_p2) target bundleno = 728 (0x2d8), region = 56  ;;  %869 = vmatprep.mubr.msk.f32.mxu0 (!%p289_p2), %vm385_vm0, %v329_v1  ;;  %948 = vset.pattern.permute.xlu0 (!%p289_p2), %v960_v2  ;;  %v337_v3 = vld [vmem:[%s1133_s2] sm:$0xff] (!%p289_p2)  ;;  %v338_v5 = vld [vmem:[%s1133_s2 + $0x8] sm:$0xff] (!%p289_p2)  ;;  %v340_v6 = vld [vmem:[%s1133_s2 + $0x18] sm:$0xff] (!%p289_p2)  ;;  %vm555_vm2 = vcmask (!%p289_p2), 523264   ;;  %vm962_vm3 = vmmov (!%p289_p2), 0  }
   0x9   : > { %949 = vset.pattern.permute.xlu1 (!%p289_p2), %v960_v2  ;;  %347 = vperm.xlu0 (!%p289_p2), %948, %v337_v3   ;;  %v330_v8 = vld [vmem:[%s1132_s1 + $0x8] sm:$0xff] (!%p289_p2)  ;;  %v331_v9 = vld [vmem:[%s1132_s1 + $0x10] sm:$0xff] (!%p289_p2)  ;;  %v341_v10 = vld [vmem:[%s1133_s2 + $0x20] sm:$0xff] (!%p289_p2)  ;;  %v961_v2 = vmov (!%p289_p2), 0.0|0.0   ;;  %v963_v3 = vmov (!%p289_p2), 0.0   ;;  %vm664_vm4 = vcmask (!%p289_p2), 261120  }
   0xa   : > { %357 = vperm.xlu1 (!%p289_p2), %949, %v339_v4   ;;  %v342_v11 = vld [vmem:[%s1133_s2 + $0x28] sm:$0xff] (!%p289_p2)  ;;  %v332_v12 = vld [vmem:[%s1132_s1 + $0x18] sm:$0xff] (!%p289_p2)  ;;  %v333_v13 = vld [vmem:[%s1132_s1 + $0x20] sm:$0xff] (!%p289_p2) }
   0xb   : > { %v343_v14 = vld [vmem:[%s1133_s2 + $0x30] sm:$0xff] (!%p289_p2)  ;;  %v344_v15 = vld [vmem:[%s1133_s2 + $0x38] sm:$0xff] (!%p289_p2)  ;;  %v334_v16 = vld [vmem:[%s1132_s1 + $0x28] sm:$0xff] (!%p289_p2) }
   0xc   : > { %v335_v17 = vld [vmem:[%s1132_s1 + $0x30] sm:$0xff] (!%p289_p2)  ;;  %v531_v18 = vld [vmem:[%s1135_s4] sm:$0xff] (!%p289_p2)  ;;  %v532_v19 = vld [vmem:[%s1135_s4 + $0x8] sm:$0xff] (!%p289_p2) }
   0xd   : > { %352 = vperm.xlu0 (!%p289_p2), %948, %v338_v5   ;;  %v336_v20 = vld [vmem:[%s1132_s1 + $0x38] sm:$0xff] (!%p289_p2)  ;;  %v533_v21 = vld [vmem:[%s1135_s4 + $0x10] sm:$0xff] (!%p289_p2)  ;;  %v658_v23 = vld [vmem:[%s1137_s6] sm:$0xf] (!%p289_p2) }
   0xe   : > { %362 = vperm.xlu1 (!%p289_p2), %949, %v340_v6   ;;  %v534_v22 = vld [vmem:[%s1135_s4 + $0x18] sm:$0xff] (!%p289_p2)  ;;  %v739_v24 = vld [vmem:[%s1138_s7] sm:$0xf] (!%p289_p2)  ;;  %v528_v63 = vld [vmem:[%s1134_s3 + $0x8] sm:$0xff] (!%p289_p2) }
   0xf   : > { %s1142_s12 = smov (!%p321_p3, %s819_s12), 1  ;;  %v756_v25 = vld [vmem:[#allocation2] sm:$0x1]  ;;  %v529_v0 = vld [vmem:[%s1134_s3 + $0x10] sm:$0xff]  ;;  %v530_v1 = vld [vmem:[%s1134_s3 + $0x18] sm:$0xff] }
  0x10   : > { %s824_s18 = sshll.u32 %s1142_s12, 2  ;;  %v527_v26 = vld [vmem:[%s1134_s3] sm:$0xff]  ;;  %s327_s13 = scalar_lea.vmem %s1140_s9, %s1142_s12 }
  0x11   : > { %s324_s23 = scalar_lea.vmem %s1131_s0, %s824_s18  ;;  %367 = vperm.xlu0 %948, %v341_v10   ;;  %897 = vmatprep.mubr.msk.f32.mxu1 %vm555_vm2, %v527_v26 }
  0x12   : > { %v328_v7 = vld [vmem:[%s324_s23] sm:$0xf]  ;;  %372 = vperm.xlu1 %949, %v342_v11  }
  0x13   : > { %867 = vmatprep.subr.msk.mxu0 %vm410_vm1, %v328_v7 }
  0x14   : > { %868 = vmatpush3.msk.msra.mxu0 %vm410_vm1, %v328_v7 }
  0x15   : > { %870 = vmatmul.mubr.msk.f32.vlgmr.msra.gmra.mrb[0].mxu0 %vm385_vm0, %v330_v8  ;;  %377 = vperm.xlu0 %948, %v343_v14  }
  0x16   : > { %872 = vmatprep.mubr.msk.f32.mxu0 %vm385_vm0, %v331_v9  ;;  %382 = vperm.xlu1 %949, %v344_v15  }
  0x17   : > { %930 = vmatprep.subr.bf16.mxu0 %v961_v2 }
  0x19   : > { %873 = vmatmul.mubr.msk.f32.gmra.mrb[2].mxu0 %vm385_vm0, %v332_v12  ;;  %537 = vperm.xlu0 %948, %v531_v18  }
  0x1a   : > { %875 = vmatprep.mubr.msk.f32.mxu0 %vm385_vm0, %v333_v13  ;;  %542 = vperm.xlu1 %949, %v532_v19  }
  0x1d   : > { %876 = vmatmul.mubr.msk.f32.gmra.mrb[4].mxu0 %vm385_vm0, %v334_v16  ;;  %547 = vperm.xlu0 %948, %v533_v21  }
  0x1e   : > { %878 = vmatprep.mubr.msk.f32.mxu0 %vm385_vm0, %v335_v17  ;;  %552 = vperm.xlu1 %949, %v534_v22   ;;  %v657_v22 = vld [vmem:[%s1136_s5] sm:$0xf] }
  0x21   : > { %879 = vmatmul.mubr.msk.f32.gmra.mrb[6].mxu0 %vm385_vm0, %v336_v20  ;;  %661 = vperm.xlu0 %948, %v658_v23  }
  0x22   : > { %742 = vperm.xlu1 %949, %v739_v24   ;;  %911 = vmatprep.mubr.msk.f32.mxu0 %vm962_vm3, %v963_v3 }
  0x25   : > { %759 = vperm.xlu0 %948, %v756_v25   ;;  %v762_v25 = vlaneseq }
  0x88   : > { %v348_v27 = vpop.permute.xlu0 %347 }
  0x89   : > { %v358_v28 = vpop.permute.xlu1 %357 }
  0x8c   : > { %v353_v29 = vpop.permute.xlu0 %352 }
  0x8d   : > { %v363_v30 = vpop.permute.xlu1 %362 }
  0x90   : > { %v368_v43 = vpop.permute.xlu0 %367 }
  0x91   : > { %v373_v40 = vpop.permute.xlu1 %372 }
  0x94   : > { %v378_v55 = vpop.permute.xlu0 %377 }
  0x95   : > { %v383_v52 = vpop.permute.xlu1 %382 }
  0x98   : > { %v538_v5 = vpop.permute.xlu0 %537 }
  0x99   : > { %v543_v4 = vpop.permute.xlu1 %542 }
  0x9c   : > { %v548_v14 = vpop.permute.xlu0 %547 }
  0x9d   : > { %v553_v11 = vpop.permute.xlu1 %552 }
  0xa0   : > { %v662_v23 = vpop.permute.xlu0 %661 }
  0xe8   : > { %v871_v31 = vpop.f32.mrb[0].mxu0 }
  0xe9   : > { %v486_v32 = vadd.f32 %v871_v31, %v353_v29  ;;  %v480_v33 = vpop.f32.mrb[1].mxu0  ;;  %v743_v29 = vpop.permute.xlu1 %742 }
  0xea   : > { %v481_v34 = vadd.f32 %v480_v33, %v348_v27 }
  0xeb   : > { %v520_v35 = vmax.f32 %v486_v32, 0.0 }
  0xec   : > { %v519_v36 = vmax.f32 %v481_v34, 0.0  ;;  %v874_v37 = vpop.f32.mrb[2].mxu0 }
  0xed   : > { %v496_v38 = vadd.f32 %v874_v37, %v363_v30  ;;  %v490_v39 = vpop.f32.mrb[3].mxu0  ;;  %v763_v30 = vshrl.u32 %v762_v25, 7 }
  0xee   : > { %v491_v41 = vadd.f32 %v490_v39, %v358_v28  ;;  %v914_v42 = vpack.c.bf16 %v520_v35, %v519_v36  ;;  %v760_v36 = vpop.permute.xlu0 %759 }
  0xef   : > { %v522_v44 = vmax.f32 %v496_v38, 0.0  ;;  %v764_v33 = vsub.s32 0, %v763_v30 }
  0xf0   : > { %v521_v45 = vmax.f32 %v491_v41, 0.0  ;;  %v877_v46 = vpop.f32.mrb[4].mxu0  ;;  %915 = vmatprep.subr.bf16.mxu1 %v914_v42 }
  0xf1   : > { %v506_v47 = vadd.f32 %v877_v46, %v373_v40  ;;  %v500_v48 = vpop.f32.mrb[5].mxu0  ;;  %917 = vmatpush3.bf16.msra.mxu1 %v914_v42  ;;  %v765_v39 = vrot.slane %v760_v36, %v764_v33 }
  0xf2   : > { %v918_v49 = vpack.c.bf16 %v522_v44, %v521_v45  ;;  %v501_v50 = vadd.f32 %v500_v48, %v368_v43 }
  0xf3   : > { %v524_v51 = vmax.f32 %v506_v47, 0.0 }
  0xf4   : > { %v523_v53 = vmax.f32 %v501_v50, 0.0  ;;  %v880_v54 = vpop.f32.mrb[6].mxu0  ;;  %919 = vmatprep.subr.bf16.mxu1 %v918_v49 }
  0xf5   : > { %v516_v56 = vadd.f32 %v880_v54, %v383_v52  ;;  %v510_v57 = vpop.f32.mrb[7].mxu0  ;;  %921 = vmatpush3.bf16.msra.mxu1 %v918_v49 }
  0xf6   : > { %v922_v58 = vpack.c.bf16 %v524_v51, %v523_v53  ;;  %v511_v59 = vadd.f32 %v510_v57, %v378_v55 }
  0xf7   : > { %v526_v60 = vmax.f32 %v516_v56, 0.0 }
  0xf8   : > { %v525_v61 = vmax.f32 %v511_v59, 0.0  ;;  %923 = vmatprep.subr.bf16.mxu1 %v922_v58 }
  0xf9   : > { %925 = vmatpush3.bf16.msra.mxu1 %v922_v58 }
  0xfa   : > { %v926_v62 = vpack.c.bf16 %v526_v60, %v525_v61 }
  0xfc   : > { %927 = vmatprep.subr.bf16.mxu1 %v926_v62 }
  0xfd   : > { %929 = vmatpush3.bf16.msra.mxu1 %v926_v62 }
 0x100   : > { %898 = vmatmul.mubr.msk.f32.vlgmr.msra.gmra.mrb[0].mxu1 %vm555_vm2, %v528_v63 }
 0x101   : > { %900 = vmatprep.mubr.msk.f32.mxu1 %vm555_vm2, %v529_v0 }
 0x104   : > { %901 = vmatmul.mubr.msk.f32.gmra.mrb[2].mxu1 %vm555_vm2, %v530_v1 }
 0x1d3   : > { %v899_v6 = vpop.f32.mrb[0].mxu1 }
 0x1d4   : > { %v640_v7 = vadd.f32 %v899_v6, %v543_v4  ;;  %v634_v8 = vpop.f32.mrb[1].mxu1 }
 0x1d5   : > { %v635_v9 = vadd.f32 %v634_v8, %v538_v5 }
 0x1d6   : > { %v654_v10 = vmax.f32 %v640_v7, 0.0 }
 0x1d7   : > { %v653_v12 = vmax.f32 %v635_v9, 0.0  ;;  %v902_v13 = vpop.f32.mrb[2].mxu1 }
 0x1d8   : > { %v650_v15 = vadd.f32 %v902_v13, %v553_v11  ;;  %v644_v16 = vpop.f32.mrb[3].mxu1 }
 0x1d9   : > { %v931_v17 = vpack.c.bf16 %v654_v10, %v653_v12  ;;  %v645_v18 = vadd.f32 %v644_v16, %v548_v14 }
 0x1da   : > { %v656_v19 = vmax.f32 %v650_v15, 0.0 }
 0x1db   : > { %v655_v20 = vmax.f32 %v645_v18, 0.0  ;;  %932 = vmatpush3.bf16.msra.mxu0 %v931_v17 }
 0x1dc   : > { %933 = vmatprep.subr.bf16.mxu0 %v961_v2 }
 0x1dd   : > { %v934_v21 = vpack.c.bf16 %v656_v19, %v655_v20 }
 0x1df   : > { %935 = vmatpush3.bf16.msra.mxu0 %v934_v21 }
 0x1e2   : > { %912 = vmatmul.mubr.msk.f32.vlgmr.msra.gmra.mrb[8].mxu0 %vm664_vm4, %v657_v22 }
 0x2b5   : > { %v734_v24 = vpop.f32.mrb[8].mxu0 }
 0x2b6   : > { %v735_v26 = vadd.f32 %v734_v24, %v662_v23  ;;  %v913_v27 = vpop.f32.mrb[9].mxu0 }
 0x2b8   : > { %v738_v28 = vmax.f32 %v735_v26, 0.0 }
 0x2ba   : > { %v745_v31 = vmul.f32 %v743_v29, %v738_v28 }
 0x2bc   : > { %v747_v32 = vrot.slane %v745_v31, 1  ;;  %v750_v35 = vrot.slane %v745_v31, 2  ;;  %v753_v38 = vrot.slane %v745_v31, 3 }
 0x2be   : > { %v749_v34 = vadd.f32 %v747_v32, %v745_v31 }
 0x2c0   : > { %v752_v37 = vadd.f32 %v750_v35, %v749_v34 }
 0x2c2   : > { %v755_v40 = vadd.f32 %v753_v38, %v752_v37 }
 0x2c4   : > { %v766_v41 = vadd.f32 %v765_v39, %v755_v40 }
 0x2c6   : > { %v767_v42 = vmul.f32 0.5, %v766_v41 }
 0x2c8   : > { %950 = vtanh.f32 %v767_v42 }
 0x2d2   : > { %v951_v43 = vpop.eup %950 }
 0x2d3   : > { %v769_v44 = vadd.f32 1.0, %v951_v43 }
 0x2d5   : > { %v770_v45 = vmul.f32 0.5, %v769_v44 }
 0x2d7   : > { %771 = vst [vmem:[%s327_s13] sm:$0x1] %v770_v45 }
 0x2d8 PF: > { %s21_s11 = sadd.s32 1, %s958_s11  }
 0x2d9   : > { %p18_p4 = scmp.ge.s32.totalorder %s21_s11, 4  }
 0x2db   :  { %20 = sbr.rel (!%p18_p4) target bundleno = 3 (0x3), region = 86 }

</bundles_post_ra>
